<compile_context>
chip_gen: v5e
topology: v5e:2x2
jax: 0.10.0
libtpu: 0.0.40
codegen_flags: <defaults>
</compile_context>

<pallas_src>
import functools
import math

import jax
import jax.numpy as jnp
from jax.experimental import pallas as pl
from jax.experimental.pallas import tpu as pltpu

# Full-f32 accuracy for the (tiny) reduction matmuls; mean/var must not be
# computed at 1-pass bf16 precision.
_MM_PRECISION = jax.lax.Precision.HIGHEST


def _cdiv(a, b):
    return (a + b - 1) // b


def _round_up(a, b):
    return _cdiv(a, b) * b


# ---------------------------------------------------------------------------
# Kernels
# ---------------------------------------------------------------------------
def _ln_fold_kernel(x_ref, w_ref, b_ref, s_ref, o_ref, *, eps):
    """Lane-folded LayerNorm: k logical rows of width C per physical row (kc lanes).

    s_ref is the (kc, kc) block-diagonal matrix with 1/C in each (C x C) block,
    so x @ S is the per-segment mean broadcast back to every lane of its segment.
    """
    x = x_ref[...].astype(jnp.float32)            # (tm, kc)
    w = w_ref[...].astype(jnp.float32)            # (1,  kc)
    b = b_ref[...].astype(jnp.float32)            # (1,  kc)
    s = s_ref[...]                                # (kc, kc) f32
    mu = jnp.dot(x, s, precision=_MM_PRECISION,
                 preferred_element_type=jnp.float32)
    d = x - mu
    var = jnp.dot(d * d, s, precision=_MM_PRECISION,
                  preferred_element_type=jnp.float32)
    inv = jax.lax.rsqrt(var + eps)
    o_ref[...] = (d * inv * w + b).astype(o_ref.dtype)


def _ln_plain_kernel(x_ref, w_ref, b_ref, o_ref, *, eps):
    """Unfolded LayerNorm over the full last axis (C a multiple of 128, or unfoldable)."""
    x = x_ref[...].astype(jnp.float32)            # (tm, C)
    w = w_ref[...].astype(jnp.float32)            # (1,  C)
    b = b_ref[...].astype(jnp.float32)            # (1,  C)
    mu = jnp.mean(x, axis=-1, keepdims=True)
    d = x - mu
    var = jnp.mean(d * d, axis=-1, keepdims=True)
    inv = jax.lax.rsqrt(var + eps)
    o_ref[...] = (d * inv * w + b).astype(o_ref.dtype)


# ---------------------------------------------------------------------------
# Launch helper
# ---------------------------------------------------------------------------
def _launch(x2, w_row, b_row, s_mat, *, eps, max_tm=4096):
    """Run the row-wise kernel on x2: (m, kc). w_row/b_row: (1, kc). s_mat: (kc,kc) or None."""
    m, kc = x2.shape
    dtype = x2.dtype
    itemsize = jnp.dtype(dtype).itemsize
    sublane = {4: 8, 2: 16, 1: 32}.get(itemsize, 8)
    fold = s_mat is not None

    # ---- row-tile selection (biggest tile within a conservative VMEM budget) ----
    budget = 28 * 1024 * 1024
    per_row = kc * (4 * itemsize + 16)        # 2x double-buffered in/out + f32 temps
    tm = max(sublane, min(max_tm, budget // per_row))
    tm = (tm // sublane) * sublane
    # Prefer >= 4 grid steps (pipeline overlap; 2 TCs on v7x) only while each
    # step still moves >= ~1 MiB of input — never shrink below that.
    min_bw_rows = _round_up(_cdiv(1 << 20, kc * itemsize), sublane)
    tm_split = _round_up(_cdiv(m, 4), sublane)
    tm = min(tm, max(tm_split, min(min_bw_rows, tm)))
    if m <= tm:
        tm = m                                # single full-span block (always legal)
    grid = _cdiv(m, tm)                       # ragged last block: no padding needed

    # ---- footprint-derived VMEM limit -------------------------------------------
    pipe_bytes = 4 * tm * kc * itemsize                       # 2 bufs x (in + out)
    const_bytes = 4 * kc * itemsize + (2 * kc * kc * 4 if fold else 0)
    temp_bytes = 4 * tm * kc * 4                              # f32 temporaries
    vmem_limit = int(1.5 * (pipe_bytes + const_bytes + temp_bytes)) + (1 << 20)
    vmem_limit = min(max(vmem_limit, 8 << 20), 64 << 20)

    if fold:
        kernel = functools.partial(_ln_fold_kernel, eps=eps)
        in_specs = [
            pl.BlockSpec((tm, kc), lambda i: (i, 0)),
            pl.BlockSpec((1, kc), lambda i: (0, 0)),
            pl.BlockSpec((1, kc), lambda i: (0, 0)),
            pl.BlockSpec((kc, kc), lambda i: (0, 0)),
        ]
        args = (x2, w_row, b_row, s_mat)
    else:
        kernel = functools.partial(_ln_plain_kernel, eps=eps)
        in_specs = [
            pl.BlockSpec((tm, kc), lambda i: (i, 0)),
            pl.BlockSpec((1, kc), lambda i: (0, 0)),
            pl.BlockSpec((1, kc), lambda i: (0, 0)),
        ]
        args = (x2, w_row, b_row)

    cost = pl.CostEstimate(
        flops=int(m) * int(kc) * (10 + (4 * int(kc) if fold else 2)),
        transcendentals=int(m) * int(kc),
        bytes_accessed=2 * int(m) * int(kc) * itemsize + const_bytes,
    )

    return pl.pallas_call(
        kernel,
        out_shape=jax.ShapeDtypeStruct((m, kc), dtype),
        grid_spec=pltpu.PrefetchScalarGridSpec(
            num_scalar_prefetch=0,
            grid=(grid,),
            in_specs=in_specs,
            out_specs=pl.BlockSpec((tm, kc), lambda i: (i, 0)),
        ),
        compiler_params=pltpu.CompilerParams(
            dimension_semantics=("parallel",),
            vmem_limit_bytes=vmem_limit,
        ),
        cost_estimate=cost,
    )(*args)


# ---------------------------------------------------------------------------
# Public wrapper (matches PyTorch WithBias_LayerNorm.forward semantics)
# ---------------------------------------------------------------------------
def _pick_fold(c):
    """Smallest k with (k*c) % 128 == 0, if it keeps kc (and S) small enough."""
    if c % 128 == 0:
        return 1
    k = math.lcm(c, 128) // c
    if k <= 16 and k * c <= 512:
        return k
    return 1


def _jax_layernorm(x, weight, bias, eps):
    xf = x.astype(jnp.float32)
    mu = jnp.mean(xf, axis=-1, keepdims=True)
    d = xf - mu
    var = jnp.mean(d * d, axis=-1, keepdims=True)
    y = d * jax.lax.rsqrt(var + eps)
    y = y * weight.astype(jnp.float32) + bias.astype(jnp.float32)
    return y.astype(x.dtype)


def withbias_layernorm(x, weight, bias, *, eps=1e-5):
    """y = (x - mean) / sqrt(var + eps) * weight + bias, over the last axis."""
    orig_shape = x.shape
    C = orig_shape[-1]

    x2 = x.reshape(-1, C)
    M = x2.shape[0]
    if M == 0:
        return x

    k = _pick_fold(C)
    kc = k * C

    w_row = jnp.reshape(weight, (1, C))
    b_row = jnp.reshape(bias, (1, C))
    w_fold = jnp.tile(w_row, (1, k)) if k > 1 else w_row
    b_fold = jnp.tile(b_row, (1, k)) if k > 1 else b_row
    if k > 1:
        seg = jnp.arange(kc) // C
        s_mat = jnp.where(seg[:, None] == seg[None, :],
                          jnp.float32(1.0 / C), jnp.float32(0.0))
    else:
        s_mat = None

    r = M % k
    m_main = M - r

    outs = []
    if m_main > 0:
        x_main = x2 if r == 0 else x2[:m_main]        # common case: no copy at all
        xf = x_main.reshape(m_main // k, kc)          # free reshape (contiguous rows)
        out_main = _launch(xf, w_fold, b_fold, s_mat, eps=eps)
        outs.append(out_main.reshape(m_main, C))
    if r > 0:
        # Tiny tail (< k <= 16 rows): pure-JAX fallback instead of a full-tensor
        # pad + output slice round trip.
        outs.append(_jax_layernorm(x2[m_main:], weight, bias, eps))

    out = outs[0] if len(outs) == 1 else jnp.concatenate(outs, axis=0)
    return out.reshape(orig_shape)


# ---------------------------------------------------------------------------
# Self-test
# ---------------------------------------------------------------------------
def _reference(x, weight, bias, eps=1e-5):
    xf = x.astype(jnp.float32)
    mu = jnp.mean(xf, axis=-1, keepdims=True)
    var = jnp.mean((xf - mu) ** 2, axis=-1, keepdims=True)
    y = (xf - mu) / jnp.sqrt(var + eps) * weight.astype(jnp.float32) \
        + bias.astype(jnp.float32)
    return y.astype(x.dtype)


if __name__ == "__main__":
    key = jax.random.PRNGKey(0)
    kx, kw, kb, kz, kv = jax.random.split(key, 5)

    # 1) Main case: (B, N, C) with C=32 -> lane-folded MXU path (k=4, kc=128),
    #    M divisible by k -> zero-copy path (no pad, no slice).
    B, N, C = 2, 64, 32
    x = jax.random.normal(kx, (B, N, C), dtype=jnp.float32)
    weight = jnp.ones((C,), dtype=jnp.float32)   # matches nn.Parameter init
    bias = jnp.zeros((C,), dtype=jnp.float32)
    y = withbias_layernorm(x, weight, bias)
    jax.block_until_ready(y)
    assert y.shape == x.shape
    assert jnp.allclose(y, _reference(x, weight, bias), atol=1e-4, rtol=1e-4), \
        "mismatch (fold path)"

    # 2) Non-trivial affine params + row count not divisible by k (tail path).
    w2 = jax.random.normal(kw, (C,), dtype=jnp.float32)
    b2 = jax.random.normal(kb, (C,), dtype=jnp.float32)
    x2 = jax.random.normal(kz, (1, 21, C), dtype=jnp.float32)
    y2 = withbias_layernorm(x2, w2, b2)
    jax.block_until_ready(y2)
    assert jnp.allclose(y2, _reference(x2, w2, b2), atol=1e-4, rtol=1e-4), \
        "mismatch (tail path)"

    # 3) Generalized fold (lcm-based): C=96 -> k=4, kc=384.
    C3 = 96
    x3 = jax.random.normal(kv, (2, 40, C3), dtype=jnp.float32)
    w3 = jax.random.normal(kw, (C3,), dtype=jnp.float32)
    b3 = jax.random.normal(kb, (C3,), dtype=jnp.float32)
    y3 = withbias_layernorm(x3, w3, b3)
    jax.block_until_ready(y3)
    assert jnp.allclose(y3, _reference(x3, w3, b3), atol=1e-4, rtol=1e-4), \
        "mismatch (C=96 fold path)"

    # 4) Unfoldable C (160): plain-kernel fallback (k=1, full-width block).
    C4 = 160
    x4 = jax.random.normal(kz, (2, 5, C4), dtype=jnp.float32)
    w4 = jnp.ones((C4,), dtype=jnp.float32)
    b4 = jnp.zeros((C4,), dtype=jnp.float32)
    y4 = withbias_layernorm(x4, w4, b4)
    jax.block_until_ready(y4)
    assert jnp.allclose(y4, _reference(x4, w4, b4), atol=1e-5, rtol=1e-5), \
        "mismatch (plain path)"

    print("KERNEL_OK")
</pallas_src>

<mosaic_0001>
module attributes {stable_mosaic.version = 11 : i64} {
  func.func @_ln_fold_kernel(%arg0: i32, %arg1: memref<32x128xf32, #tpu.memory_space<vmem>>, %arg2: memref<1x128xf32, #tpu.memory_space<vmem>>, %arg3: memref<1x128xf32, #tpu.memory_space<vmem>>, %arg4: memref<128x128xf32, #tpu.memory_space<vmem>>, %arg5: memref<32x128xf32, #tpu.memory_space<vmem>>) attributes {dimension_semantics = [#tpu.dimension_semantics<parallel>], iteration_bounds = array<i64: 1>, scalar_prefetch = 0 : i64, scratch_operands = 0 : i64, tpu.core_type = #tpu.core_type<tc>, window_params = [{transform_indices = @transform_0, window_bounds = array<i64: 32, 128>}, {pipeline_mode = #tpu.pipeline_mode<synchronous>, transform_indices = @transform_1, window_bounds = array<i64: 1, 128>}, {pipeline_mode = #tpu.pipeline_mode<synchronous>, transform_indices = @transform_2, window_bounds = array<i64: 1, 128>}, {pipeline_mode = #tpu.pipeline_mode<synchronous>, transform_indices = @transform_3, window_bounds = array<i64: 128, 128>}, {transform_indices = @transform_4, window_bounds = array<i64: 32, 128>}]} {
    %c0 = arith.constant 0 : index
    %c0_0 = arith.constant 0 : index
    %0 = vector.load %arg1[%c0, %c0_0] : memref<32x128xf32, #tpu.memory_space<vmem>>, vector<32x128xf32>
    %c0_1 = arith.constant 0 : index
    %c0_2 = arith.constant 0 : index
    %1 = vector.load %arg2[%c0_1, %c0_2] : memref<1x128xf32, #tpu.memory_space<vmem>>, vector<1x128xf32>
    %c0_3 = arith.constant 0 : index
    %c0_4 = arith.constant 0 : index
    %2 = vector.load %arg3[%c0_3, %c0_4] : memref<1x128xf32, #tpu.memory_space<vmem>>, vector<1x128xf32>
    %c0_5 = arith.constant 0 : index
    %c0_6 = arith.constant 0 : index
    %3 = vector.load %arg4[%c0_5, %c0_6] : memref<128x128xf32, #tpu.memory_space<vmem>>, vector<128x128xf32>
    %cst = arith.constant dense<0.000000e+00> : vector<32x128xf32>
    %4 = tpu.matmul %0, %3, %cst {dimension_numbers = #tpu.dot_dimension_numbers<[1], [0], [0], [1], [0, 0, 1, 1], [], []>, precision = #tpu.contract_precision<fp32>} : vector<32x128xf32>, vector<128x128xf32>, vector<32x128xf32> -> vector<32x128xf32>
    %5 = arith.subf %0, %4 : vector<32x128xf32>
    %6 = arith.mulf %5, %5 : vector<32x128xf32>
    %cst_7 = arith.constant dense<0.000000e+00> : vector<32x128xf32>
    %7 = tpu.matmul %6, %3, %cst_7 {dimension_numbers = #tpu.dot_dimension_numbers<[1], [0], [0], [1], [0, 0, 1, 1], [], []>, precision = #tpu.contract_precision<fp32>} : vector<32x128xf32>, vector<128x128xf32>, vector<32x128xf32> -> vector<32x128xf32>
    %cst_8 = arith.constant 9.99999974E-6 : f32
    %8 = vector.broadcast %cst_8 : f32 to vector<32x128xf32>
    %9 = arith.addf %7, %8 : vector<32x128xf32>
    %10 = math.rsqrt %9 : vector<32x128xf32>
    %11 = arith.mulf %5, %10 : vector<32x128xf32>
    %12 = vector.broadcast %1 : vector<1x128xf32> to vector<32x128xf32>
    %13 = arith.mulf %11, %12 : vector<32x128xf32>
    %14 = vector.broadcast %2 : vector<1x128xf32> to vector<32x128xf32>
    %15 = arith.addf %13, %14 : vector<32x128xf32>
    %c0_9 = arith.constant 0 : index
    %c0_10 = arith.constant 0 : index
    %16 = vector.load %arg5[%c0_9, %c0_10] : memref<32x128xf32, #tpu.memory_space<vmem>>, vector<32x128xf32>
    tpu.vector_store %arg5[%c0_9, %c0_10], %15 {strides = array<i32>} : memref<32x128xf32, #tpu.memory_space<vmem>>, vector<32x128xf32>,
    return
  }
  func.func @transform_0(%arg0: i32) -> (i32, i32) {
    %c0_i32 = arith.constant 0 : i32
    %c0_i32_0 = arith.constant 0 : i32
    return %arg0, %c0_i32 : i32, i32
  }
  func.func @transform_1(%arg0: i32) -> (i32, i32) {
    %c0_i32 = arith.constant 0 : i32
    %c0_i32_0 = arith.constant 0 : i32
    %c0_i32_1 = arith.constant 0 : i32
    return %c0_i32, %c0_i32_0 : i32, i32
  }
  func.func @transform_2(%arg0: i32) -> (i32, i32) {
    %c0_i32 = arith.constant 0 : i32
    %c0_i32_0 = arith.constant 0 : i32
    %c0_i32_1 = arith.constant 0 : i32
    return %c0_i32, %c0_i32_0 : i32, i32
  }
  func.func @transform_3(%arg0: i32) -> (i32, i32) {
    %c0_i32 = arith.constant 0 : i32
    %c0_i32_0 = arith.constant 0 : i32
    %c0_i32_1 = arith.constant 0 : i32
    return %c0_i32, %c0_i32_0 : i32, i32
  }
  func.func @transform_4(%arg0: i32) -> (i32, i32) {
    %c0_i32 = arith.constant 0 : i32
    %c0_i32_0 = arith.constant 0 : i32
    return %arg0, %c0_i32 : i32, i32
  }
}

</mosaic_0001>

<bundles_post_ra>
// kernel: tpu_custom_call.1
= control target key start
LH: loop header
LB: loop body
LE: loop exit
PB: predicated region body
PF: predicated region fallthrough
CT: control target
= control target key end

     0   :  { %9 = vsyncpa [#allocation3], 0  ;;  %s1674_s0 = inlined_call_operand.hbm [shape: f32[32,128], index: 0, kind: input, shape index: {}]   ;;  %s1675_s1 = inlined_call_operand.hbm [shape: f32[1,128], index: 1, kind: input, shape index: {}]   ;;  %s1676_s2 = inlined_call_operand.vmem [shape: f32[1,128], index: 2, kind: input, shape index: {}]   ;;  %s1677_s3 = inlined_call_operand.hbm [shape: f32[128,128], index: 3, kind: input, shape index: {}]   ;;  %s1678_s4 = inlined_call_operand.hbm [shape: f32[32,128], index: 4, kind: output, shape index: {}]  }
   0x1   :  { %10 = vsyncpa [#allocation6], 0  ;;  %s30_s17 = sshll.u32 %s1675_s1, 4  ;;  %s31_s17 = int_to_ptr.hbm [resolvable:$true] %s30_s17 }
   0x2   :  { %11 = vsyncpa [#allocation4], 0  ;;  %s1161_s18 = smov [#allocation5]   ;;  %s16_s22 = sshll.u32 %s1674_s0, 4  ;;  %s17_s22 = int_to_ptr.hbm [resolvable:$true] %s16_s22 }
   0x3   :  { %s32_s19 = sshll.u32 %s1161_s18, 4  ;;  %s1162_s23 = smov [#allocation2]   ;;  %s33_s19 = int_to_ptr.vmem [resolvable:$true] %s32_s19 }
   0x4   :  { %35 = dma.hbm_to_vmem [thread:$0]  %s31_s17, 16, %s33_s19, [#allocation6]  }
   0x5   :  { %s18_s24 = sshll.u32 %s1162_s23, 4  ;;  %s1163_s25 = smov 128   ;;  %s19_s24 = int_to_ptr.vmem [resolvable:$true] %s18_s24 }
   0x6   :  { %s1164_s26 = smov 8   ;;  %s42_s28 = sshll.u32 %s1677_s3, 4  ;;  %s43_s28 = int_to_ptr.hbm [resolvable:$true] %s42_s28 }
   0x7   :  { %24 = dma.hbm_to_vmem [thread:$0]  %s17_s22, 512, %s19_s24, [#allocation3], %s1163_s25, %s1163_s25, %s1164_s26  }
   0x8   :  { %s1165_s29 = smov [#allocation7]  }
   0x9   :  { %s44_s30 = sshll.u32 %s1165_s29, 4  ;;  %s45_s30 = int_to_ptr.vmem [resolvable:$true] %s44_s30 }
   0xa   :  { %50 = dma.hbm_to_vmem [thread:$0]  %s43_s28, 2048, %s45_s30, [#allocation6], %s1163_s25, %s1163_s25, %s1164_s26  }
   0xb   :  { %1155 = dma.done.wait [#allocation3], 512  }
   0xc   :  { %1156 = vsyncadd [#allocation3], 4294966784 }
   0xd   :  { %1157 = dma.done.wait [#allocation6], 2064  }
   0xe   :  { %1158 = vsyncadd [#allocation6], 4294965232  ;;  %v84_v0 = vld [vmem:[#allocation7 + $0x78] sm:$0xff]  ;;  %v83_v1 = vld [vmem:[#allocation7 + $0x70] sm:$0xff]  ;;  %s1029_s8 = sshll.u32 %s1678_s4, 4  ;;  %s1030_s8 = int_to_ptr.hbm [resolvable:$true] %s1029_s8 }
   0xf   :  { %v82_v2 = vld [vmem:[#allocation7 + $0x68] sm:$0xff]  ;;  %v1207_v3 = vand.u32 4294901760, %v84_v0  ;;  %v1209_v4 = vand.u32 4294901760, %v83_v1  ;;  %v81_v6 = vld [vmem:[#allocation7 + $0x60] sm:$0xff]  ;;  %v80_v7 = vld [vmem:[#allocation7 + $0x58] sm:$0xff] }
  0x10   :  { %v1211_v5 = vand.u32 4294901760, %v82_v2  ;;  %v79_v8 = vld [vmem:[#allocation7 + $0x50] sm:$0xff]  ;;  %v1213_v9 = vand.u32 4294901760, %v81_v6  ;;  %v1215_v10 = vand.u32 4294901760, %v80_v7  ;;  %v78_v12 = vld [vmem:[#allocation7 + $0x48] sm:$0xff]  ;;  %v77_v13 = vld [vmem:[#allocation7 + $0x40] sm:$0xff] }
  0x11   :  { %v1217_v11 = vand.u32 4294901760, %v79_v8  ;;  %86 = vmatpush.msra.mxu0 %v1207_v3  ;;  %v1221_v14 = vsub.f32 %v84_v0, %v1207_v3  ;;  %v1224_v15 = vsub.f32 %v83_v1, %v1209_v4  ;;  %333 = vmatpush.msra.mxu3 %v1207_v3  ;;  %v1230_v17 = vand.u32 4294901760, %v78_v12  ;;  %v76_v18 = vld [vmem:[#allocation7 + $0x38] sm:$0xff]  ;;  %v75_v29 = vld [vmem:[#allocation7 + $0x30] sm:$0xff]  ;;  %v74_v36 = vld [vmem:[#allocation7 + $0x28] sm:$0xff] }
  0x12   :  { %v1228_v16 = vsub.f32 %v82_v2, %v1211_v5  ;;  %v1233_v19 = vsub.f32 %v81_v6, %v1213_v9  ;;  %v1236_v20 = vsub.f32 %v80_v7, %v1215_v10  ;;  %v1238_v21 = vand.u32 4294901760, %v77_v13  ;;  %v73_v43 = vld [vmem:[#allocation7 + $0x20] sm:$0xff]  ;;  %v72_v49 = vld [vmem:[#allocation7 + $0x18] sm:$0xff]  ;;  %v71_v55 = vld [vmem:[#allocation7 + $0x10] sm:$0xff] }
  0x13   :  { %v1241_v22 = vsub.f32 %v79_v8, %v1217_v11  ;;  %88 = vmatpush.msra.mxu0 %v1209_v4  ;;  %265 = vmatpush.msra.mxu2 %v1221_v14  ;;  %v1246_v23 = vand.u32 4294901760, %v1221_v14  ;;  %v1249_v24 = vand.u32 4294901760, %v1224_v15  ;;  %v1258_v27 = vand.u32 4294901760, %v76_v18  ;;  %v1329_v56 = vld [vmem:[#allocation2] sm:$0xff]  ;;  %v70_v62 = vld [vmem:[#allocation7 + $0x8] sm:$0xff] }
  0x14   :  { %1696 = vst [vmem:[#allocation12_spill] sm:$0xff] %v1233_v19  ;;  %v1252_v25 = vand.u32 4294901760, %v1228_v16  ;;  %335 = vmatpush.msra.mxu3 %v1209_v4  ;;  %v1256_v26 = vand.u32 4294901760, %v1233_v19  ;;  %v1261_v28 = vsub.f32 %v78_v12, %v1230_v17  ;;  %v1272_v33 = vand.u32 4294901760, %v1236_v20  ;;  %v69_v8 = vld [vmem:[#allocation7] sm:$0xff] }
  0x15   :  { %1697 = vst [vmem:[#allocation13_spill] sm:$0xff] %v1236_v20  ;;  %90 = vmatpush.msra.mxu0 %v1211_v5  ;;  %268 = vmatpush.msra.mxu2 %v1224_v15  ;;  %v153_v30 = vsub.f32 %v1221_v14, %v1246_v23  ;;  %v159_v31 = vsub.f32 %v1224_v15, %v1249_v24  ;;  %v1276_v34 = vand.u32 4294901760, %v1241_v22  ;;  %v1289_v40 = vand.u32 4294901760, %v75_v29 }
  0x16   :  { %1698 = vst [vmem:[#allocation14_spill] sm:$0xff] %v1241_v22  ;;  %v165_v32 = vsub.f32 %v1228_v16, %v1252_v25  ;;  %337 = vmatpush.msra.mxu3 %v1211_v5  ;;  %v1279_v35 = vsub.f32 %v77_v13, %v1238_v21  ;;  %v171_v39 = vsub.f32 %v1233_v19, %v1256_v26  ;;  %v1293_v41 = vand.u32 4294901760, %v1261_v28 }
  0x17   :  { %1699 = vst [vmem:[#allocation15_spill] sm:$0xff] %v1261_v28  ;;  %92 = vmatpush.msra.mxu0 %v1213_v9  ;;  %v1282_v37 = vand.u32 4294901760, %v153_v30  ;;  %271 = vmatpush.msra.mxu2 %v1228_v16  ;;  %v1285_v38 = vand.u32 4294901760, %v159_v31  ;;  %v1296_v42 = vsub.f32 %v76_v18, %v1258_v27  ;;  %v177_v45 = vsub.f32 %v1236_v20, %v1272_v33  ;;  %v1379_v30 = vld [vmem:[#allocation2 + $0x8] sm:$0xff] }
  0x18   :  { %1700 = vst [vmem:[#allocation16_spill] sm:$0xff] %v1279_v35  ;;  %339 = vmatpush.msra.mxu3 %v1213_v9  ;;  %v1300_v44 = vand.u32 4294901760, %v165_v32  ;;  %v1304_v46 = vand.u32 4294901760, %v74_v36  ;;  %v183_v47 = vsub.f32 %v1241_v22, %v1276_v34  ;;  %v1311_v48 = vand.u32 4294901760, %v1279_v35 }
  0x19   :  { %1701 = vst [vmem:[#allocation17_spill] sm:$0xff] %v1296_v42  ;;  %94 = vmatpush.msra.mxu0 %v1215_v10  ;;  %155 = vmatpush.msra.mxu1 %v1282_v37  ;;  %v1315_v50 = vand.u32 4294901760, %v171_v39  ;;  %v1317_v51 = vand.u32 4294901760, %v73_v43  ;;  %v1320_v52 = vsub.f32 %v75_v29, %v1289_v40  ;;  %v189_v53 = vsub.f32 %v1261_v28, %v1293_v41 }
  0x1a   :  { %274 = vmatpush.msra.mxu2 %v1233_v19  ;;  %341 = vmatpush.msra.mxu3 %v1215_v10  ;;  %v1327_v54 = vand.u32 4294901760, %v1296_v42  ;;  %1703 = vst [vmem:[#allocation19_spill] sm:$0xff] %v1329_v56  ;;  %v1333_v57 = vand.u32 4294901760, %v177_v45  ;;  %v1335_v58 = vand.u32 4294901760, %v72_v49  ;;  %v1338_v59 = vsub.f32 %v74_v36, %v1304_v46 }
  0x1b   :  { %96 = vmatpush.msra.mxu0 %v1217_v11  ;;  %161 = vmatpush.msra.mxu1 %v1285_v38  ;;  %1702 = vst [vmem:[#allocation18_spill] sm:$0xff] %v1320_v52  ;;  %v1341_v60 = vand.u32 4294901760, %v183_v47  ;;  %v195_v61 = vsub.f32 %v1279_v35, %v1311_v48  ;;  %v1348_v63 = vand.u32 4294901760, %v71_v55  ;;  %v1351_v0 = vand.u32 4294901760, %v1320_v52 }
  0x1c   :  { %277 = vmatpush.msra.mxu2 %v1236_v20  ;;  %343 = vmatpush.msra.mxu3 %v1217_v11  ;;  %1704 = vst [vmem:[#allocation20_spill] sm:$0xff] %v1338_v59  ;;  %v1354_v1 = vsub.f32 %v73_v43, %v1317_v51  ;;  %v1357_v2 = vand.u32 4294901760, %v1329_v56  ;;  %v1360_v6 = vand.u32 4294901760, %v189_v53  ;;  %v201_v7 = vsub.f32 %v1296_v42, %v1327_v54 }
  0x1d   :  { %98 = vmatpush.msra.mxu0 %v1230_v17  ;;  %167 = vmatpush.msra.mxu1 %v1300_v44  ;;  %v1367_v12 = vand.u32 4294901760, %v70_v62  ;;  %v1370_v13 = vand.u32 4294901760, %v1338_v59  ;;  %v1373_v18 = vsub.f32 %v72_v49, %v1335_v58  ;;  %1707 = vst [vmem:[#allocation23_spill] sm:$0xff] %v1379_v30  ;;  %v1382_v31 = vand.u32 4294901760, %v195_v61 }
  0x1e   :  { %280 = vmatpush.msra.mxu2 %v1241_v22  ;;  %345 = vmatpush.msra.mxu3 %v1230_v17  ;;  %1705 = vst [vmem:[#allocation21_spill] sm:$0xff] %v1354_v1  ;;  %v1377_v29 = vsub.f32 %v1329_v56, %v1357_v2  ;;  %v207_v32 = vsub.f32 %v1320_v52, %v1351_v0  ;;  %v1389_v36 = vand.u32 4294901760, %v69_v8  ;;  %v1392_v39 = vand.u32 4294901760, %v1354_v1 }
  0x1f   :  { %100 = vmatpush.msra.mxu0 %v1238_v21  ;;  %173 = vmatpush.msra.mxu1 %v1315_v50  ;;  %1706 = vst [vmem:[#allocation22_spill] sm:$0xff] %v1373_v18  ;;  %v1395_v43 = vsub.f32 %v71_v55, %v1348_v63  ;;  %v1401_v47 = vand.u32 4294901760, %v1379_v30  ;;  %v1405_v49 = vand.u32 4294901760, %v201_v7  ;;  %v213_v53 = vsub.f32 %v1338_v59, %v1370_v13 }
  0x20   :  { %283 = vmatpush.msra.mxu2 %v1261_v28  ;;  %347 = vmatpush.msra.mxu3 %v1238_v21  ;;  %v119_v45 = vand.u32 4294901760, %v1377_v29  ;;  %v1410_v55 = vand.u32 4294901760, %v1373_v18  ;;  %v1413_v61 = vsub.f32 %v70_v62, %v1367_v12  ;;  %v1419_v56 = vand.u32 4294901760, %v207_v32 }
  0x21   :  { %102 = vmatpush.msra.mxu0 %v1258_v27  ;;  %179 = vmatpush.msra.mxu1 %v1333_v57  ;;  %1708 = vst [vmem:[#allocation24_spill] sm:$0xff] %v1395_v43  ;;  %v219_v7 = vsub.f32 %v1354_v1, %v1392_v39  ;;  %v1438_v32 = vand.u32 4294901760, %v213_v53 }
  0x22   :  { %286 = vmatpush.msra.mxu2 %v1279_v35  ;;  %349 = vmatpush.msra.mxu3 %v1258_v27  ;;  %1709 = vst [vmem:[#allocation25_spill] sm:$0xff] %v1419_v56  ;;  %v1427_v35 = vsub.f32 %v69_v8, %v1389_v36  ;;  %v120_v62 = vsub.f32 %v1377_v29, %v119_v45  ;;  %v1443_v28 = vand.u32 4294901760, %v1413_v61 }
  0x23   :  { %104 = vmatpush.msra.mxu0 %v1289_v40  ;;  %185 = vmatpush.msra.mxu1 %v1341_v60  ;;  %1710 = vst [vmem:[#allocation26_spill] sm:$0xff] %v1438_v32  ;;  %v225_v8 = vsub.f32 %v1373_v18, %v1410_v55 }
  0x24   :  { %289 = vmatpush.msra.mxu2 %v1296_v42  ;;  %351 = vmatpush.msra.mxu3 %v1289_v40  ;;  %v1424_v42 = vand.u32 4294901760, %v1395_v43  ;;  %v1456_v22 = vand.u32 4294901760, %v1427_v35  ;;  %v121_v20 = vand.u32 4294901760, %v120_v62 }
  0x25   :  { %106 = vmatpush.msra.mxu0 %v1304_v46  ;;  %191 = vmatpush.msra.mxu1 %v1360_v6 }
  0x26   :  { %292 = vmatpush.msra.mxu2 %v1320_v52  ;;  %353 = vmatpush.msra.mxu3 %v1304_v46  ;;  %v1434_v52 = vsub.f32 %v1379_v30, %v1401_v47  ;;  %v1451_v30 = vand.u32 4294901760, %v219_v7  ;;  %v231_v53 = vsub.f32 %v1395_v43, %v1424_v42  ;;  %v1466_v7 = vand.u32 4294901760, %v225_v8 }
  0x27   :  { %108 = vmatpush.msra.mxu0 %v1317_v51  ;;  %197 = vmatpush.msra.mxu1 %v1382_v31 }
  0x28   :  { %295 = vmatpush.msra.mxu2 %v1338_v59  ;;  %355 = vmatpush.msra.mxu3 %v1317_v51  ;;  %v1445_v59 = vld [vmem:[#allocation2 + $0x10] sm:$0xff]  ;;  %1712 = vst [vmem:[#allocation28_spill] sm:$0xff] %v1451_v30  ;;  %v1474_v62 = vand.u32 4294901760, %v231_v53 }
  0x29   :  { %110 = vmatpush.msra.mxu0 %v1335_v58  ;;  %203 = vmatpush.msra.mxu1 %v1405_v49  ;;  %1711 = vst [vmem:[#allocation27_spill] sm:$0xff] %v1445_v59  ;;  %v1462_v19 = vand.u32 4294901760, %v1445_v59 }
  0x2a   :  { %298 = vmatpush.msra.mxu2 %v1354_v1  ;;  %357 = vmatpush.msra.mxu3 %v1335_v58  ;;  %v127_v1 = vand.u32 4294901760, %v1434_v52 }
  0x2b   :  { %112 = vmatpush.msra.mxu0 %v1348_v63  ;;  %209 = vmatpush.msra.mxu1 %v1419_v56  ;;  %v237_v56 = vsub.f32 %v1413_v61, %v1443_v28 }
  0x2c   :  { %301 = vmatpush.msra.mxu2 %v1373_v18  ;;  %359 = vmatpush.msra.mxu3 %v1348_v63  ;;  %v243_v18 = vsub.f32 %v1427_v35, %v1456_v22  ;;  %v128_v8 = vsub.f32 %v1434_v52, %v127_v1 }
  0x2d   :  { %114 = vmatpush.msra.mxu0 %v1367_v12  ;;  %215 = vmatpush.msra.mxu1 %v1438_v32  ;;  %v134_v32 = vsub.f32 %v1445_v59, %v1462_v19 }
  0x2e   :  { %304 = vmatpush.msra.mxu2 %v1395_v43  ;;  %361 = vmatpush.msra.mxu3 %v1367_v12  ;;  %v1484_v43 = vand.u32 4294901760, %v237_v56  ;;  %v129_v53 = vand.u32 4294901760, %v128_v8 }
  0x2f   :  { %116 = vmatpush.msra.mxu0 %v1389_v36  ;;  %221 = vmatpush.msra.mxu1 %v1451_v30  ;;  %v1486_v30 = vld [vmem:[#allocation2 + $0x18] sm:$0xff]  ;;  %v135_v59 = vand.u32 4294901760, %v134_v32 }
  0x30   :  { %122 = vmatmul.f32.vlgmr.msra.gmra.mxu0 %v121_v20  ;;  %307 = vmatpush.msra.mxu2 %v1413_v61  ;;  %v1492_v20 = vand.u32 4294901760, %v243_v18  ;;  %v1496_v56 = vand.u32 4294901760, %v1486_v30 }
  0x31   :  { %227 = vmatpush.msra.mxu1 %v1466_v7  ;;  %392 = vmatpush.msrb.mxu0 %v1246_v23  ;;  %v136_v18 = vsub.f32 %v134_v32, %v135_v59 }
  0x32   :  { %310 = vmatpush.msra.mxu2 %v1427_v35  ;;  %363 = vmatpush.msra.mxu3 %v1389_v36 }
  0x33   :  { %233 = vmatpush.msra.mxu1 %v1474_v62  ;;  %396 = vmatpush.msrb.mxu0 %v1249_v24 }
  0x34   :  { %313 = vmatmul.f32.vlgmr.msra.gmra.mxu2 %v1377_v29  ;;  %367 = vmatmul.f32.vlgmr.msra.gmra.mxu3 %v119_v45  ;;  %v142_v29 = vsub.f32 %v1486_v30, %v1496_v56 }
  0x35   :  { %239 = vmatpush.msra.mxu1 %v1484_v43  ;;  %400 = vmatpush.msrb.mxu0 %v1252_v25 }
  0x36   :  { %597 = vmatpush.msrb.mxu3 %v1282_v37  ;;  %528 = vmatpush.msrb.mxu2 %v1207_v3  ;;  %v137_v37 = vand.u32 4294901760, %v136_v18  ;;  %v143_v45 = vand.u32 4294901760, %v142_v29 }
  0x37   :  { %245 = vmatpush.msra.mxu1 %v1492_v20  ;;  %404 = vmatpush.msrb.mxu0 %v1256_v26 }
  0x38   :  { %130 = vmatmul.f32.gmra.mxu0 %v129_v53  ;;  %247 = vmatmul.f32.vlgmr.msra.gmra.mxu1 %v1357_v2 }
  0x39   :  { %471 = vmatpush.msrb.mxu1 %v1207_v3  ;;  %408 = vmatpush.msrb.mxu0 %v1272_v33 }
  0x3a   :  { %603 = vmatpush.msrb.mxu3 %v1285_v38  ;;  %530 = vmatpush.msrb.mxu2 %v1209_v4  ;;  %v144_v38 = vsub.f32 %v142_v29, %v143_v45 }
  0x3b   :  { %473 = vmatpush.msrb.mxu1 %v1209_v4  ;;  %412 = vmatpush.msrb.mxu0 %v1276_v34 }
  0x3c   :  { %318 = vmatmul.f32.gmra.mxu2 %v1434_v52  ;;  %373 = vmatmul.f32.gmra.mxu3 %v127_v1  ;;  %v1716_v52 = vld [vmem:[#allocation26_spill] sm:$0xff]  ;;  %v1721_v1 = vld [vmem:[#allocation17_spill] sm:$0xff] }
  0x3d   :  { %475 = vmatpush.msrb.mxu1 %v1211_v5  ;;  %416 = vmatpush.msrb.mxu0 %v1293_v41 }
  0x3e   :  { %609 = vmatpush.msrb.mxu3 %v1300_v44  ;;  %532 = vmatpush.msrb.mxu2 %v1211_v5  ;;  %v145_v44 = vand.u32 4294901760, %v144_v38 }
  0x3f   :  { %477 = vmatpush.msrb.mxu1 %v1213_v9  ;;  %420 = vmatpush.msrb.mxu0 %v1311_v48 }
  0x40   :  { %138 = vmatmul.f32.gmra.mxu0 %v137_v37  ;;  %251 = vmatmul.f32.gmra.mxu1 %v1401_v47 }
  0x41   :  { %479 = vmatpush.msrb.mxu1 %v1215_v10  ;;  %424 = vmatpush.msrb.mxu0 %v1327_v54 }
  0x42   :  { %615 = vmatpush.msrb.mxu3 %v1315_v50  ;;  %534 = vmatpush.msrb.mxu2 %v1213_v9  ;;  %v1713_v50 = vld [vmem:[#allocation25_spill] sm:$0xff] }
  0x43   :  { %481 = vmatpush.msrb.mxu1 %v1217_v11  ;;  %428 = vmatpush.msrb.mxu0 %v1351_v0 }
  0x44   :  { %323 = vmatmul.f32.gmra.mxu2 %v134_v32  ;;  %379 = vmatmul.f32.gmra.mxu3 %v135_v59  ;;  %v1719_v59 = vld [vmem:[#allocation15_spill] sm:$0xff] }
  0x45   :  { %483 = vmatpush.msrb.mxu1 %v1230_v17  ;;  %432 = vmatpush.msrb.mxu0 %v1370_v13  ;;  %v1728_v32 = vld [vmem:[#allocation23_spill] sm:$0xff] }
  0x46   :  { %621 = vmatpush.msrb.mxu3 %v1333_v57  ;;  %536 = vmatpush.msrb.mxu2 %v1215_v10  ;;  %v1718_v57 = vld [vmem:[#allocation28_spill] sm:$0xff] }
  0x47   :  { %485 = vmatpush.msrb.mxu1 %v1238_v21  ;;  %436 = vmatpush.msrb.mxu0 %v1392_v39 }
  0x48   :  { %146 = vmatmul.f32.gmra.mxu0 %v145_v44  ;;  %255 = vmatmul.f32.gmra.mxu1 %v1462_v19 }
  0x49   :  { %487 = vmatpush.msrb.mxu1 %v1258_v27  ;;  %440 = vmatpush.msrb.mxu0 %v1410_v55 }
  0x4a   :  { %627 = vmatpush.msrb.mxu3 %v1341_v60  ;;  %538 = vmatpush.msrb.mxu2 %v1217_v11  ;;  %v1720_v60 = vld [vmem:[#allocation16_spill] sm:$0xff] }
  0x4b   :  { %489 = vmatpush.msrb.mxu1 %v1289_v40  ;;  %444 = vmatpush.msrb.mxu0 %v1424_v42 }
  0x4c   :  { %328 = vmatmul.f32.gmra.mxu2 %v142_v29  ;;  %385 = vmatmul.f32.gmra.mxu3 %v143_v45 }
  0x4d   :  { %491 = vmatpush.msrb.mxu1 %v1304_v46  ;;  %448 = vmatpush.msrb.mxu0 %v1443_v28 }
  0x4e   :  { %633 = vmatpush.msrb.mxu3 %v1360_v6  ;;  %540 = vmatpush.msrb.mxu2 %v1230_v17  ;;  %v1723_v6 = vld [vmem:[#allocation20_spill] sm:$0xff] }
  0x4f   :  { %493 = vmatpush.msrb.mxu1 %v1317_v51  ;;  %452 = vmatpush.msrb.mxu0 %v1456_v22 }
  0x50   :  { %259 = vmatmul.f32.gmra.mxu1 %v1496_v56  ;;  %454 = vmatmul.f32.vlgmr.msrb.gmra.mxu0 %v1357_v2 }
  0x51   :  { %495 = vmatpush.msrb.mxu1 %v1335_v58  ;;  %707 = vmatpush.msra.mxu0 %v1221_v14  ;;  %v1714_v14 = vld [vmem:[#allocation12_spill] sm:$0xff] }
  0x52   :  { %639 = vmatpush.msrb.mxu3 %v1382_v31  ;;  %542 = vmatpush.msrb.mxu2 %v1238_v21  ;;  %v1724_v31 = vld [vmem:[#allocation21_spill] sm:$0xff] }
  0x53   :  { %497 = vmatpush.msrb.mxu1 %v1348_v63  ;;  %710 = vmatpush.msra.mxu0 %v1224_v15  ;;  %v1715_v15 = vld [vmem:[#allocation13_spill] sm:$0xff] }
  0x54   :  { %645 = vmatpush.msrb.mxu3 %v1405_v49  ;;  %544 = vmatpush.msrb.mxu2 %v1258_v27 }
  0x55   :  { %499 = vmatpush.msrb.mxu1 %v1367_v12  ;;  %713 = vmatpush.msra.mxu0 %v1228_v16  ;;  %v1717_v16 = vld [vmem:[#allocation14_spill] sm:$0xff] }
  0x56   :  { %651 = vmatpush.msrb.mxu3 %v1713_v50  ;;  %546 = vmatpush.msrb.mxu2 %v1289_v40 }
  0x57   :  { %501 = vmatpush.msrb.mxu1 %v1389_v36  ;;  %716 = vmatpush.msra.mxu0 %v1714_v14 }
  0x58   :  { %458 = vmatmul.f32.gmra.mxu0 %v1401_v47  ;;  %503 = vmatmul.f32.vlgmr.msrb.gmra.mxu1 %v1357_v2  ;;  %v1722_v2 = vld [vmem:[#allocation18_spill] sm:$0xff] }
  0x59   :  { %775 = vmatpush.msra.mxu1 %v1207_v3  ;;  %719 = vmatpush.msra.mxu0 %v1715_v15 }
  0x5a   :  { %657 = vmatpush.msrb.mxu3 %v1716_v52  ;;  %548 = vmatpush.msrb.mxu2 %v1304_v46  ;;  %v1729_v52 = vld [vmem:[#allocation27_spill] sm:$0xff] }
  0x5b   :  { %777 = vmatpush.msra.mxu1 %v1209_v4  ;;  %722 = vmatpush.msra.mxu0 %v1717_v16 }
  0x5c   :  { %663 = vmatpush.msrb.mxu3 %v1718_v57  ;;  %550 = vmatpush.msrb.mxu2 %v1317_v51 }
  0x5d   :  { %779 = vmatpush.msra.mxu1 %v1211_v5  ;;  %725 = vmatpush.msra.mxu0 %v1719_v59 }
  0x5e   :  { %669 = vmatpush.msrb.mxu3 %v1466_v7  ;;  %552 = vmatpush.msrb.mxu2 %v1335_v58 }
  0x5f   :  { %781 = vmatpush.msra.mxu1 %v1213_v9  ;;  %728 = vmatpush.msra.mxu0 %v1720_v60 }
  0x60   :  { %462 = vmatmul.f32.gmra.mxu0 %v1462_v19  ;;  %507 = vmatmul.f32.gmra.mxu1 %v1401_v47  ;;  %v1726_v47 = vld [vmem:[#allocation24_spill] sm:$0xff] }
  0x61   :  { %783 = vmatpush.msra.mxu1 %v1215_v10  ;;  %731 = vmatpush.msra.mxu0 %v1721_v1 }
  0x62   :  { %675 = vmatpush.msrb.mxu3 %v1474_v62  ;;  %554 = vmatpush.msrb.mxu2 %v1348_v63 }
  0x63   :  { %785 = vmatpush.msra.mxu1 %v1217_v11  ;;  %734 = vmatpush.msra.mxu0 %v1722_v2 }
  0x64   :  { %681 = vmatpush.msrb.mxu3 %v1484_v43  ;;  %556 = vmatpush.msrb.mxu2 %v1367_v12  ;;  %v1725_v43 = vld [vmem:[#allocation22_spill] sm:$0xff] }
  0x65   :  { %787 = vmatpush.msra.mxu1 %v1230_v17  ;;  %737 = vmatpush.msra.mxu0 %v1723_v6 }
  0x66   :  { %687 = vmatpush.msrb.mxu3 %v1492_v20  ;;  %558 = vmatpush.msrb.mxu2 %v1389_v36 }
  0x67   :  { %789 = vmatpush.msra.mxu1 %v1238_v21  ;;  %740 = vmatpush.msra.mxu0 %v1724_v31 }
  0x68   :  { %466 = vmatmul.f32.gmra.mxu0 %v1496_v56  ;;  %511 = vmatmul.f32.gmra.mxu1 %v1462_v19 }
  0x69   :  { %791 = vmatpush.msra.mxu1 %v1258_v27  ;;  %743 = vmatpush.msra.mxu0 %v1725_v43 }
  0x6a   :  { %913 = vmatpush.msra.mxu3 %v1207_v3  ;;  %834 = vmatpush.msra.mxu2 %v1246_v23 }
  0x6b   :  { %793 = vmatpush.msra.mxu1 %v1289_v40  ;;  %746 = vmatpush.msra.mxu0 %v1726_v47 }
  0x6c   :  { %915 = vmatpush.msra.mxu3 %v1209_v4  ;;  %838 = vmatpush.msra.mxu2 %v1249_v24 }
  0x6d   :  { %795 = vmatpush.msra.mxu1 %v1304_v46  ;;  %749 = vmatpush.msra.mxu0 %v1413_v61 }
  0x6e   :  { %917 = vmatpush.msra.mxu3 %v1211_v5  ;;  %842 = vmatpush.msra.mxu2 %v1252_v25 }
  0x6f   :  { %797 = vmatpush.msra.mxu1 %v1317_v51  ;;  %752 = vmatpush.msra.mxu0 %v1427_v35 }
  0x70   :  { %515 = vmatmul.f32.gmra.mxu1 %v1496_v56  ;;  %919 = vmatpush.msra.mxu3 %v1213_v9 }
  0x71   :  { %799 = vmatpush.msra.mxu1 %v1335_v58  ;;  %846 = vmatpush.msra.mxu2 %v1256_v26 }
  0x72   :  { %921 = vmatpush.msra.mxu3 %v1215_v10 }
  0x73   :  { %801 = vmatpush.msra.mxu1 %v1348_v63  ;;  %850 = vmatpush.msra.mxu2 %v1272_v33 }
  0x74   :  { %923 = vmatpush.msra.mxu3 %v1217_v11 }
  0x75   :  { %803 = vmatpush.msra.mxu1 %v1367_v12  ;;  %854 = vmatpush.msra.mxu2 %v1276_v34 }
  0x76   :  { %925 = vmatpush.msra.mxu3 %v1230_v17 }
  0x77   :  { %805 = vmatpush.msra.mxu1 %v1389_v36  ;;  %858 = vmatpush.msra.mxu2 %v1293_v41 }
  0x78   :  { %927 = vmatpush.msra.mxu3 %v1238_v21 }
  0x79   :  { %862 = vmatpush.msra.mxu2 %v1311_v48 }
  0x7a   :  { %929 = vmatpush.msra.mxu3 %v1258_v27 }
  0x7b   :  { %866 = vmatpush.msra.mxu2 %v1327_v54 }
  0x7c   :  { %931 = vmatpush.msra.mxu3 %v1289_v40 }
  0x7d   :  { %870 = vmatpush.msra.mxu2 %v1351_v0 }
  0x7e   :  { %933 = vmatpush.msra.mxu3 %v1304_v46  ;;  %v1727_v46 = vld [vmem:[#allocation19_spill] sm:$0xff] }
  0x7f   :  { %874 = vmatpush.msra.mxu2 %v1370_v13 }
  0x80   :  { %935 = vmatpush.msra.mxu3 %v1317_v51 }
  0x81   :  { %878 = vmatpush.msra.mxu2 %v1392_v39 }
  0x82   :  { %937 = vmatpush.msra.mxu3 %v1335_v58 }
  0x83   :  { %882 = vmatpush.msra.mxu2 %v1410_v55 }
  0x84   :  { %939 = vmatpush.msra.mxu3 %v1348_v63 }
  0x85   :  { %886 = vmatpush.msra.mxu2 %v1424_v42 }
  0x86   :  { %941 = vmatpush.msra.mxu3 %v1367_v12 }
  0x87   :  { %890 = vmatpush.msra.mxu2 %v1443_v28 }
  0x88   :  { %943 = vmatpush.msra.mxu3 %v1389_v36 }
  0x89   :  { %894 = vmatpush.msra.mxu2 %v1456_v22 }
  0xad   :  { %v123_v3 = vpop.f32.mrf.mxu0 }
  0xb5   :  { %v131_v4 = vpop.f32.mrf.mxu0  ;;  %v248_v5 = vpop.f32.mrf.mxu1 }
  0xb6   :  { %v249_v23 = vadd.f32 %v248_v5, %v123_v3 }
  0xb7   :  { %v314_v11 = vpop.f32.mrf.mxu2  ;;  %v368_v21 = vpop.f32.mrf.mxu3 }
  0xb8   :  { %v315_v26 = vadd.f32 %v314_v11, %v249_v23 }
  0xba   :  { %v369_v33 = vadd.f32 %v368_v21, %v315_v26 }
  0xbd   :  { %v139_v9 = vpop.f32.mrf.mxu0  ;;  %v252_v10 = vpop.f32.mrf.mxu1 }
  0xbe   :  { %v253_v28 = vadd.f32 %v252_v10, %v131_v4 }
  0xbf   :  { %v319_v27 = vpop.f32.mrf.mxu2  ;;  %v374_v34 = vpop.f32.mrf.mxu3 }
  0xc0   :  { %v320_v41 = vadd.f32 %v319_v27, %v253_v28 }
  0xc2   :  { %v375_v54 = vadd.f32 %v374_v34, %v320_v41 }
  0xc5   :  { %v147_v17 = vpop.f32.mrf.mxu0  ;;  %v256_v19 = vpop.f32.mrf.mxu1 }
  0xc6   :  { %v257_v58 = vadd.f32 %v256_v19, %v139_v9 }
  0xc7   :  { %v324_v51 = vpop.f32.mrf.mxu2  ;;  %v380_v13 = vpop.f32.mrf.mxu3 }
  0xc8   :  { %v325_v39 = vadd.f32 %v324_v51, %v257_v58 }
  0xca   :  { %v381_v8 = vadd.f32 %v380_v13, %v325_v39 }
  0xcd   :  { %v260_v24 = vpop.f32.mrf.mxu1  ;;  %v455_v25 = vpop.f32.mrf.mxu0 }
  0xce   :  { %v456_v35 = vadd.f32 %v455_v25, %v369_v33  ;;  %v261_v20 = vadd.f32 %v260_v24, %v147_v17 }
  0xcf   :  { %v329_v18 = vpop.f32.mrf.mxu2  ;;  %v386_v15 = vpop.f32.mrf.mxu3 }
  0xd0   :  { %v330_v44 = vadd.f32 %v329_v18, %v261_v20 }
  0xd2   :  { %v387_v60 = vadd.f32 %v386_v15, %v330_v44 }
  0xd5   :  { %v459_v40 = vpop.f32.mrf.mxu0  ;;  %v504_v22 = vpop.f32.mrf.mxu1 }
  0xd6   :  { %v505_v42 = vadd.f32 %v504_v22, %v456_v35  ;;  %v460_v0 = vadd.f32 %v459_v40, %v375_v54 }
  0xd8   :  { %v1642_v48 = vsub.f32 %v1727_v46, %v505_v42 }
  0xda   :  { %v523_v63 = vmul.f32 %v1642_v48, %v1642_v48 }
  0xdc   :  { %v559_v12 = vand.u32 4294901760, %v523_v63 }
  0xdd   :  { %v508_v36 = vpop.f32.mrf.mxu1  ;;  %v463_v61 = vpop.f32.mrf.mxu0 }
  0xde   :  { %v560_v49 = vsub.f32 %v523_v63, %v559_v12  ;;  %v509_v55 = vadd.f32 %v508_v36, %v460_v0  ;;  %689 = vmatmul.f32.vlgmr.msrb.gmra.mxu3 %v559_v12  ;;  %v464_v29 = vadd.f32 %v463_v61, %v381_v8 }
  0xe0   :  { %v1647_v7 = vsub.f32 %v1728_v32, %v509_v55  ;;  %755 = vmatmul.f32.vlgmr.msra.gmra.mxu0 %v560_v49  ;;  %v561_v62 = vand.u32 4294901760, %v560_v49 }
  0xe2   :  { %v524_v53 = vmul.f32 %v1647_v7, %v1647_v7  ;;  %809 = vmatmul.f32.vlgmr.msra.gmra.mxu1 %v561_v62  ;;  %v562_v56 = vsub.f32 %v560_v49, %v561_v62 }
  0xe4   :  { %v567_v37 = vand.u32 4294901760, %v524_v53  ;;  %v563_v45 = vand.u32 4294901760, %v562_v56 }
  0xe5   :  { %v512_v38 = vpop.f32.mrf.mxu1  ;;  %v467_v59 = vpop.f32.mrf.mxu0 }
  0xe6   :  { %v513_v50 = vadd.f32 %v512_v38, %v464_v29  ;;  %564 = vmatmul.f32.vlgmr.msrb.gmra.mxu2 %v563_v45  ;;  %693 = vmatmul.f32.gmra.mxu3 %v567_v37  ;;  %v568_v14 = vsub.f32 %v524_v53, %v567_v37  ;;  %v468_v6 = vadd.f32 %v467_v59, %v387_v60 }
  0xe8   :  { %v1652_v16 = vsub.f32 %v1729_v52, %v513_v50  ;;  %760 = vmatmul.f32.gmra.mxu0 %v568_v14  ;;  %v569_v57 = vand.u32 4294901760, %v568_v14 }
  0xea   :  { %v525_v1 = vmul.f32 %v1652_v16, %v1652_v16  ;;  %815 = vmatmul.f32.gmra.mxu1 %v569_v57  ;;  %v570_v2 = vsub.f32 %v568_v14, %v569_v57 }
  0xec   :  { %v575_v31 = vand.u32 4294901760, %v525_v1  ;;  %v571_v43 = vand.u32 4294901760, %v570_v2 }
  0xed   :  { %v516_v47 = vpop.f32.mrf.mxu1 }
  0xee   :  { %v517_v3 = vadd.f32 %v516_v47, %v468_v6  ;;  %572 = vmatmul.f32.gmra.mxu2 %v571_v43  ;;  %697 = vmatmul.f32.gmra.mxu3 %v575_v31  ;;  %v576_v4 = vsub.f32 %v525_v1, %v575_v31 }
  0xf0   :  { %v1657_v5 = vsub.f32 %v1486_v30, %v517_v3  ;;  %765 = vmatmul.f32.gmra.mxu0 %v576_v4  ;;  %v577_v9 = vand.u32 4294901760, %v576_v4 }
  0xf2   :  { %v526_v10 = vmul.f32 %v1657_v5, %v1657_v5  ;;  %821 = vmatmul.f32.gmra.mxu1 %v577_v9  ;;  %v578_v11 = vsub.f32 %v576_v4, %v577_v9  ;;  %v1049_v4 = vld [vmem:[#allocation5] ss:$0 sm:$0xff] }
  0xf4   :  { %v583_v17 = vand.u32 4294901760, %v526_v10  ;;  %v579_v19 = vand.u32 4294901760, %v578_v11 }
  0xf6   :  { %580 = vmatmul.f32.gmra.mxu2 %v579_v19  ;;  %701 = vmatmul.f32.gmra.mxu3 %v583_v17  ;;  %v584_v21 = vsub.f32 %v526_v10, %v583_v17 }
  0xf8   :  { %770 = vmatmul.f32.gmra.mxu0 %v584_v21  ;;  %v585_v23 = vand.u32 4294901760, %v584_v21 }
  0xfa   :  { %827 = vmatmul.f32.gmra.mxu1 %v585_v23  ;;  %v586_v24 = vsub.f32 %v584_v21, %v585_v23  ;;  %v1050_v21 = vld [vmem:[%s1676_s2] ss:$0 sm:$0xff]  ;;  %s1166_s2 = smov [#allocation8]  }
  0xfb   :  { %s1027_s5 = sshll.u32 %s1166_s2, 4  ;;  %s1028_s5 = int_to_ptr.vmem [resolvable:$true] %s1027_s5 }
  0xfc   :  { %v587_v25 = vand.u32 4294901760, %v586_v24 }
  0xfe   :  { %588 = vmatmul.f32.gmra.mxu2 %v587_v25  ;;  %945 = vmatmul.f32.vlgmr.msra.gmra.mxu3 %v559_v12 }
 0x106   :  { %896 = vmatmul.f32.vlgmr.msra.gmra.mxu2 %v559_v12  ;;  %949 = vmatmul.f32.gmra.mxu3 %v567_v37 }
 0x10e   :  { %900 = vmatmul.f32.gmra.mxu2 %v567_v37  ;;  %953 = vmatmul.f32.gmra.mxu3 %v575_v31 }
 0x116   :  { %904 = vmatmul.f32.gmra.mxu2 %v575_v31  ;;  %957 = vmatmul.f32.gmra.mxu3 %v583_v17 }
 0x11e   :  { %908 = vmatmul.f32.gmra.mxu2 %v583_v17 }
 0x15d   :  { %v756_v22 = vpop.f32.mrf.mxu0 }
 0x15f   :  { %v810_v42 = vpop.f32.mrf.mxu1 }
 0x161   :  { %v690_v30 = vpop.f32.mrf.mxu3 }
 0x165   :  { %v761_v63 = vpop.f32.mrf.mxu0 }
 0x167   :  { %v816_v39 = vpop.f32.mrf.mxu1 }
 0x169   :  { %v565_v26 = vpop.f32.mrf.mxu2  ;;  %v694_v27 = vpop.f32.mrf.mxu3 }
 0x16a   :  { %v566_v40 = vadd.f32 1e-05, %v565_v26 }
 0x16c   :  { %v691_v41 = vadd.f32 %v690_v30, %v566_v40 }
 0x16d   :  { %v766_v20 = vpop.f32.mrf.mxu0 }
 0x16e   :  { %v757_v54 = vadd.f32 %v756_v22, %v691_v41 }
 0x16f   :  { %v822_v38 = vpop.f32.mrf.mxu1 }
 0x170   :  { %v811_v12 = vadd.f32 %v810_v42, %v757_v54 }
 0x171   :  { %v573_v33 = vpop.f32.mrf.mxu2  ;;  %v698_v28 = vpop.f32.mrf.mxu3 }
 0x172   :  { %v574_v51 = vadd.f32 1e-05, %v573_v33 }
 0x174   :  { %v695_v0 = vadd.f32 %v694_v27, %v574_v51 }
 0x175   :  { %v771_v1 = vpop.f32.mrf.mxu0 }
 0x176   :  { %v762_v61 = vadd.f32 %v761_v63, %v695_v0 }
 0x177   :  { %v828_v9 = vpop.f32.mrf.mxu1 }
 0x178   :  { %v817_v8 = vadd.f32 %v816_v39, %v762_v61 }
 0x179   :  { %v581_v34 = vpop.f32.mrf.mxu2  ;;  %v702_v35 = vpop.f32.mrf.mxu3 }
 0x17a   :  { %v582_v49 = vadd.f32 1e-05, %v581_v34 }
 0x17c   :  { %v699_v62 = vadd.f32 %v698_v28, %v582_v49 }
 0x17e   :  { %v767_v45 = vadd.f32 %v766_v20, %v699_v62 }
 0x180   :  { %v823_v15 = vadd.f32 %v822_v38, %v767_v45 }
 0x181   :  { %v589_v46 = vpop.f32.mrf.mxu2  ;;  %v946_v58 = vpop.f32.mrf.mxu3 }
 0x182   :  { %v590_v29 = vadd.f32 1e-05, %v589_v46 }
 0x184   :  { %v703_v14 = vadd.f32 %v702_v35, %v590_v29 }
 0x186   :  { %v772_v43 = vadd.f32 %v771_v1, %v703_v14 }
 0x188   :  { %v829_v19 = vadd.f32 %v828_v9, %v772_v43 }
 0x189   :  { %v897_v13 = vpop.f32.mrf.mxu2  ;;  %v950_v32 = vpop.f32.mrf.mxu3 }
 0x18a   :  { %v898_v36 = vadd.f32 %v897_v13, %v811_v12 }
 0x18c   :  { %v947_v55 = vadd.f32 %v946_v58, %v898_v36 }
 0x18e   :  { %1051 = vrsqrt.f32 %v947_v55  ;;  %vm967_vm1 = vweird.f32 %v947_v55 }
 0x191   :  { %v901_v53 = vpop.f32.mrf.mxu2  ;;  %v954_v57 = vpop.f32.mrf.mxu3 }
 0x192   :  { %v902_v56 = vadd.f32 %v901_v53, %v817_v8 }
 0x194   :  { %v1052_v18 = vpop.eup %1051  ;;  %v951_v37 = vadd.f32 %v950_v32, %v902_v56 }
 0x195   :  { %v962_v44 = vmul.f32 %v1052_v18, %v947_v55  ;;  %vm968_vm0 = vweird.f32 %v1052_v18 }
 0x196   :  { %1053 = vrsqrt.f32 %v951_v37  ;;  %vm969_vm2 = vmor %vm967_vm1, %vm968_vm0  ;;  %vm977_vm4 = vweird.f32 %v951_v37 }
 0x197   :  { %v963_v50 = vmul.f32 %v1052_v18, %v962_v44 }
 0x199   :  { %v964_v52 = vmul.f32 0.5, %v963_v50  ;;  %v905_v59 = vpop.f32.mrf.mxu2  ;;  %v958_v27 = vpop.f32.mrf.mxu3 }
 0x19a   :  { %v906_v60 = vadd.f32 %v905_v59, %v823_v15 }
 0x19b   :  { %v965_v2 = vsub.f32 1.5, %v964_v52 }
 0x19c   :  { %v1054_v6 = vpop.eup %1053  ;;  %v955_v31 = vadd.f32 %v954_v57, %v906_v60 }
 0x19d   :  { %v966_v47 = vmul.f32 %v1052_v18, %v965_v2  ;;  %v972_v3 = vmul.f32 %v1054_v6, %v951_v37  ;;  %vm978_vm3 = vweird.f32 %v1054_v6 }
 0x19e   :  { %1055 = vrsqrt.f32 %v955_v31  ;;  %vm979_vm5 = vmor %vm977_vm4, %vm978_vm3  ;;  %vm987_vm7 = vweird.f32 %v955_v31 }
 0x19f   :  { %v970_v10 = vsel %vm969_vm2, %v1052_v18, %v966_v47  ;;  %v973_v11 = vmul.f32 %v1054_v6, %v972_v3 }
 0x1a0   :  { %v1001_v17 = vmul.f32 %v970_v10, %v1642_v48 }
 0x1a1   :  { %v974_v23 = vmul.f32 0.5, %v973_v11  ;;  %v909_v24 = vpop.f32.mrf.mxu2 }
 0x1a2   :  { %v1008_v25 = vmul.f32 %v1049_v4, %v1001_v17  ;;  %v910_v30 = vadd.f32 %v909_v24, %v829_v19 }
 0x1a3   :  { %v975_v26 = vsub.f32 1.5, %v974_v23 }
 0x1a4   :  { %v1056_v33 = vpop.eup %1055  ;;  %v959_v28 = vadd.f32 %v958_v27, %v910_v30  ;;  %v1015_v34 = vadd.f32 %v1050_v21, %v1008_v25 }
 0x1a5   :  { %v976_v35 = vmul.f32 %v1054_v6, %v975_v26  ;;  %v982_v40 = vmul.f32 %v1056_v33, %v955_v31  ;;  %vm988_vm6 = vweird.f32 %v1056_v33 }
 0x1a6   :  { %1057 = vrsqrt.f32 %v959_v28  ;;  %1019 = vst [vmem:[#allocation8] sm:$0xff] %v1015_v34  ;;  %vm989_vm8 = vmor %vm987_vm7, %vm988_vm6  ;;  %vm997_vm10 = vweird.f32 %v959_v28 }
 0x1a7   :  { %v980_v48 = vsel %vm979_vm5, %v1054_v6, %v976_v35  ;;  %v983_v22 = vmul.f32 %v1056_v33, %v982_v40 }
 0x1a8   :  { %v1002_v41 = vmul.f32 %v980_v48, %v1647_v7 }
 0x1a9   :  { %v984_v42 = vmul.f32 0.5, %v983_v22 }
 0x1aa   :  { %v1009_v46 = vmul.f32 %v1049_v4, %v1002_v41 }
 0x1ab   :  { %v985_v51 = vsub.f32 1.5, %v984_v42 }
 0x1ac   :  { %v1058_v54 = vpop.eup %1057  ;;  %v1016_v58 = vadd.f32 %v1050_v21, %v1009_v46 }
 0x1ad   :  { %v986_v63 = vmul.f32 %v1056_v33, %v985_v51  ;;  %v992_v0 = vmul.f32 %v1058_v54, %v959_v28  ;;  %vm998_vm9 = vweird.f32 %v1058_v54 }
 0x1ae   :  { %1020 = vst [vmem:[#allocation8 + $0x8] sm:$0xff] %v1016_v58  ;;  %vm999_vm11 = vmor %vm997_vm10, %vm998_vm9 }
 0x1af   :  { %v990_v12 = vsel %vm989_vm8, %v1056_v33, %v986_v63  ;;  %v993_v13 = vmul.f32 %v1058_v54, %v992_v0 }
 0x1b0   :  { %v1003_v36 = vmul.f32 %v990_v12, %v1652_v16 }
 0x1b1   :  { %v994_v39 = vmul.f32 0.5, %v993_v13 }
 0x1b2   :  { %v1010_v49 = vmul.f32 %v1049_v4, %v1003_v36 }
 0x1b3   :  { %v995_v55 = vsub.f32 1.5, %v994_v39 }
 0x1b4   :  { %v1017_v7 = vadd.f32 %v1050_v21, %v1010_v49 }
 0x1b5   :  { %v996_v61 = vmul.f32 %v1058_v54, %v995_v55 }
 0x1b6   :  { %1021 = vst [vmem:[#allocation8 + $0x10] sm:$0xff] %v1017_v7 }
 0x1b7   :  { %v1000_v32 = vsel %vm999_vm11, %v1058_v54, %v996_v61 }
 0x1b8   :  { %v1004_v62 = vmul.f32 %v1000_v32, %v1657_v5 }
 0x1ba   :  { %v1011_v8 = vmul.f32 %v1049_v4, %v1004_v62 }
 0x1bc   :  { %v1018_v16 = vadd.f32 %v1050_v21, %v1011_v8 }
 0x1be   :  { %1022 = vst [vmem:[#allocation8 + $0x18] sm:$0xff] %v1018_v16 }
 0x1bf   :  { %1035 = dma.vmem_to_hbm [thread:$0]  %s1028_s5, 512, %s1030_s8, [#allocation4], %s1163_s25, %s1163_s25, %s1164_s26  }
 0x1c0   :  { %1159 = dma.done.wait [#allocation4], 512  }
 0x1c1   :  { %1160 = vsyncadd [#allocation4], 4294966784 }
 0x1c2   :  { %1040 = vsyncpa [#allocation3], 1 }
 0x1c3   :  { %1041 = vsyncpa [#allocation6], 1 }
 0x1c4   :  { %1042 = vsyncpa [#allocation4], 1 }

</bundles_post_ra>
